<compile_context>
chip_gen: v7x
topology: tpu7x:2x2x1
jax: 0.10.0
libtpu: 0.0.40
codegen_flags: <defaults>
</compile_context>

<pallas_src>
import functools

import jax
import jax.numpy as jnp
from jax.experimental import pallas as pl
from jax.experimental.pallas import tpu as pltpu


# ------------------------------------------------------------------
# helpers
# ------------------------------------------------------------------

def _round_up(x, m):
    return ((x + m - 1) // m) * m


def _pick_tm(m, tm_max=2048):
    """Largest tile <= tm_max that is a multiple of 8 and divides m (no padding)."""
    t = min(tm_max, m)
    t -= t % 8
    while t >= 8:
        if m % t == 0:
            return t, m
        t -= 8
    mp = _round_up(m, 8)
    return mp, mp


def _pick_th(ho):
    """Row-chunk height: exact divisor of ho giving >=2 chunks when possible."""
    for th in (28, 16, 14, 8, 7, 4):
        if ho % th == 0 and ho // th >= 2:
            return th
    return ho


# ------------------------------------------------------------------
# Pallas kernels
# ------------------------------------------------------------------

def _mm_kernel(x_ref, w_ref, b_ref, o_ref, *, act):
    """out = act(x @ w + b), act in {"none", "relu", "relu6"}."""
    y = jnp.dot(x_ref[...], w_ref[...], preferred_element_type=jnp.float32)
    y = y + b_ref[...]
    if act == "relu6":
        y = jnp.minimum(jnp.maximum(y, 0.0), 6.0)
    elif act == "relu":
        y = jnp.maximum(y, 0.0)
    o_ref[...] = y.astype(o_ref.dtype)


def _fused_block_kernel(*refs, stride, has_expand, has_residual, H, W):
    """Fused MobileNetV2 inverted-residual block for one (batch, row-chunk) step.

    The per-batch input is passed as `n_ph = stride*stride` spatial phases folded along
    the row axis (1 phase for stride 1 = the zero-padded input; 4 phases for stride 2),
    so every depthwise tap is a contiguous slice.  Expansion (1x1 + ReLU6) is computed
    in-kernel on the row chunk only; padding positions of the *expanded* activation are
    zeroed with a mask (matches PyTorch's zero padding of the dw input).  The expanded
    activation never leaves VMEM.
    """
    if has_expand:
        ph_ref, we_ref, be_ref, wd_ref, bd_ref, wpj_ref, bpj_ref, o_ref = refs
    else:
        ph_ref, wd_ref, bd_ref, wpj_ref, bpj_ref, o_ref = refs
        we_ref = be_ref = None

    j = pl.program_id(1)
    _, TH, wo, cout = o_ref.shape
    hidden = wd_ref.shape[2]
    cin = ph_ref.shape[3]
    wp = ph_ref.shape[2]
    n_ph = stride * stride
    hp = ph_ref.shape[1] // n_ph
    PR = TH + 3 - stride                       # phase rows needed for TH output rows
    row0 = j * TH

    # ---- expansion (1x1 conv + ReLU6) on the row chunk of every phase, mask padding
    exp = []
    raw0 = None
    for p in range(n_ph):
        pi, pj = p // stride, p % stride
        chunk = ph_ref[0, pl.ds(p * hp + row0, PR), :, :]          # (PR, wp, cin) bf16
        if p == 0:
            raw0 = chunk                                           # reused for residual
        if has_expand:
            l_idx = jax.lax.broadcasted_iota(jnp.int32, (PR, wp), 0)
            b_idx = jax.lax.broadcasted_iota(jnp.int32, (PR, wp), 1)
            row_g = stride * (row0 + l_idx) + pi                   # global padded row
            col_g = stride * b_idx + pj                            # global padded col
            valid = (row_g >= 1) & (row_g <= H) & (col_g >= 1) & (col_g <= W)
            e = jnp.dot(chunk.reshape(PR * wp, cin), we_ref[...],
                        preferred_element_type=jnp.float32) + be_ref[...]
            e = jnp.minimum(jnp.maximum(e, 0.0), 6.0).reshape(PR, wp, hidden)
            e = jnp.where(valid[:, :, None], e, 0.0)
        else:
            e = chunk.astype(jnp.float32)                          # padding already 0
        exp.append(e)

    # ---- depthwise 3x3 (+bias, ReLU6); column slice hoisted out of the ki loop
    acc = jnp.zeros((TH, wo, hidden), jnp.float32)
    for kj in range(3):
        oj = kj // stride
        col_cache = {}
        for ki in range(3):
            p = (ki % stride) * stride + (kj % stride)
            if p not in col_cache:
                col_cache[p] = exp[p][:, oj:oj + wo, :]            # hoisted col slice
            oi = ki // stride
            tap = col_cache[p][oi:oi + TH, :, :]                   # contiguous row slice
            acc = acc + tap * wd_ref[ki * 3 + kj].astype(jnp.float32)
    h = jnp.minimum(jnp.maximum(acc + bd_ref[...].astype(jnp.float32), 0.0), 6.0)

    # ---- projection 1x1 (linear) + fused residual
    y = jnp.dot(h.reshape(TH * wo, hidden).astype(jnp.bfloat16), wpj_ref[...],
                preferred_element_type=jnp.float32) + bpj_ref[...]
    if has_residual:
        res = raw0[1:1 + TH, 1:1 + wo, :].reshape(TH * wo, cout)
        y = y + res.astype(jnp.float32)
    o_ref[0] = y.reshape(TH, wo, cout).astype(o_ref.dtype)


def _head_gap_kernel(x_ref, w_ref, b_ref, o_ref, acc_ref, *, s_total):
    """Fused head 1x1 conv (C -> 1280, ReLU6) + global average pool over spatial."""
    j = pl.program_id(1)

    @pl.when(j == 0)
    def _():
        acc_ref[...] = jnp.zeros_like(acc_ref)

    ts = x_ref.shape[1]
    y = jnp.dot(x_ref[0], w_ref[...], preferred_element_type=jnp.float32)
    y = y + b_ref[...]
    y = jnp.minimum(jnp.maximum(y, 0.0), 6.0)
    row = jax.lax.broadcasted_iota(jnp.int32, (ts, 1), 0) + j * ts
    y = jnp.where(row < s_total, y, 0.0)                 # mask padded spatial rows
    acc_ref[...] = acc_ref[...] + jnp.sum(y, axis=0, keepdims=True)

    @pl.when(j == pl.num_programs(1) - 1)
    def _():
        o_ref[...] = (acc_ref[...] * (1.0 / s_total)).astype(o_ref.dtype)


def _classifier_kernel(x_ref, w1_ref, b1_ref, w2_ref, b2_ref, w3_ref, b3_ref, o_ref):
    """Fused classifier: Linear-ReLU-Linear-ReLU-Linear (Dropout = identity)."""
    h = jnp.dot(x_ref[...], w1_ref[...], preferred_element_type=jnp.float32) + b1_ref[...]
    h = jnp.maximum(h, 0.0)
    h = jnp.dot(h, w2_ref[...], preferred_element_type=jnp.float32) + b2_ref[...]
    h = jnp.maximum(h, 0.0)
    y = jnp.dot(h, w3_ref[...], preferred_element_type=jnp.float32) + b3_ref[...]
    o_ref[...] = y.astype(o_ref.dtype)


# ------------------------------------------------------------------
# Pallas wrappers
# ------------------------------------------------------------------

_VMEM_LIMIT = 32 * 1024 * 1024   # < v7x 64 MiB physical, > v5e 16 MiB scoped default


def matmul_bias_act(x, w, b, act="none", out_dtype=jnp.bfloat16, tm_max=2048):
    """act(x[M,K] @ w[K,N] + b[1,N]), tiled over M on the MXU (divisor tile, no pad)."""
    m, k = x.shape
    n = w.shape[1]
    tm, mp = _pick_tm(m, tm_max)
    xp = x.astype(jnp.bfloat16)
    if mp != m:
        xp = jnp.pad(xp, ((0, mp - m), (0, 0)))
    out = pl.pallas_call(
        functools.partial(_mm_kernel, act=act),
        out_shape=jax.ShapeDtypeStruct((mp, n), out_dtype),
        grid=(mp // tm,),
        in_specs=[
            pl.BlockSpec((tm, k), lambda i: (i, 0)),
            pl.BlockSpec((k, n), lambda i: (0, 0)),
            pl.BlockSpec((1, n), lambda i: (0, 0)),
        ],
        out_specs=pl.BlockSpec((tm, n), lambda i: (i, 0)),
        compiler_params=pltpu.CompilerParams(
            dimension_semantics=("parallel",),
            vmem_limit_bytes=_VMEM_LIMIT),
    )(xp, w.astype(jnp.bfloat16), b.astype(jnp.float32))
    return out if mp == m else out[:m]


def fused_inverted_residual(x, blk):
    """One MobileNetV2 inverted-residual block as a single fused pallas_call."""
    nb, H, W, cin = x.shape
    stride, t, cout = blk["stride"], blk["t"], blk["cout"]
    hidden = cin * t
    ho = (H - 1) // stride + 1
    wo = (W - 1) // stride + 1
    TH = _pick_th(ho)
    n_chunks = -(-ho // TH)
    ho_pad = n_chunks * TH

    x_bf = x.astype(jnp.bfloat16)
    if stride == 1:
        hp = ho_pad + 2
        ph = jnp.pad(x_bf, ((0, 0), (1, hp - H - 1), (1, 1), (0, 0)))
    else:
        # decompose the (small, pre-expansion) padded input into 4 spatial phases,
        # folded along rows -> all dw taps become contiguous slices in-kernel.
        Hp = 2 * ho_pad + 2
        Wp = 2 * wo + 2
        xpad = jnp.pad(x_bf, ((0, 0), (1, Hp - H - 1), (1, Wp - W - 1), (0, 0)))
        ph = jnp.concatenate(
            [xpad[:, pi::2, pj::2, :] for pi in range(2) for pj in range(2)], axis=1)

    ph_rows, wp = ph.shape[1], ph.shape[2]
    has_expand = (t != 1)
    has_residual = (stride == 1 and cin == cout)

    args = [ph]
    in_specs = [pl.BlockSpec((1, ph_rows, wp, cin), lambda i, j: (i, 0, 0, 0))]
    if has_expand:
        args += [blk["expand_w"], blk["expand_b"]]
        in_specs += [pl.BlockSpec((cin, hidden), lambda i, j: (0, 0)),
                     pl.BlockSpec((1, hidden), lambda i, j: (0, 0))]
    args += [blk["dw_w"], blk["dw_b"], blk["proj_w"], blk["proj_b"]]
    in_specs += [pl.BlockSpec((9, 1, hidden), lambda i, j: (0, 0, 0)),
                 pl.BlockSpec((1, hidden), lambda i, j: (0, 0)),
                 pl.BlockSpec((hidden, cout), lambda i, j: (0, 0)),
                 pl.BlockSpec((1, cout), lambda i, j: (0, 0))]

    out = pl.pallas_call(
        functools.partial(_fused_block_kernel, stride=stride, has_expand=has_expand,
                          has_residual=has_residual, H=H, W=W),
        out_shape=jax.ShapeDtypeStruct((nb, ho_pad, wo, cout), jnp.bfloat16),
        grid=(nb, n_chunks),
        in_specs=in_specs,
        out_specs=pl.BlockSpec((1, TH, wo, cout), lambda i, j: (i, j, 0, 0)),
        compiler_params=pltpu.CompilerParams(
            dimension_semantics=("parallel", "parallel"),
            vmem_limit_bytes=_VMEM_LIMIT),
    )(*args)
    return out if ho_pad == ho else out[:, :ho]


def head_conv_gap(x_nhwc, w, b, ts=512):
    """Fused 1x1 conv (C->1280) + ReLU6 + global average pool -> [N, 1280] (f32)."""
    nb, h, wd, c = x_nhwc.shape
    n = w.shape[1]
    s = h * wd
    ts_eff = min(ts, _round_up(s, 16))
    sp = _round_up(s, ts_eff)
    x = jnp.pad(x_nhwc.reshape(nb, s, c).astype(jnp.bfloat16),
                ((0, 0), (0, sp - s), (0, 0)))
    out = pl.pallas_call(
        functools.partial(_head_gap_kernel, s_total=s),
        out_shape=jax.ShapeDtypeStruct((nb, n), jnp.float32),
        grid=(nb, sp // ts_eff),
        in_specs=[
            pl.BlockSpec((1, ts_eff, c), lambda i, j: (i, j, 0)),
            pl.BlockSpec((c, n), lambda i, j: (0, 0)),
            pl.BlockSpec((1, n), lambda i, j: (0, 0)),
        ],
        out_specs=pl.BlockSpec((1, n), lambda i, j: (i, 0)),
        scratch_shapes=[pltpu.VMEM((1, n), jnp.float32)],
        compiler_params=pltpu.CompilerParams(
            dimension_semantics=("parallel", "arbitrary"),
            vmem_limit_bytes=_VMEM_LIMIT),
    )(x, w.astype(jnp.bfloat16), b.astype(jnp.float32))
    return out


def classifier_head(feat, params):
    """Fused Linear-ReLU-Linear-ReLU-Linear; tiny operands -> single block."""
    m, d = feat.shape
    mp = _round_up(max(m, 8), 8)
    fp = jnp.pad(feat.astype(jnp.float32), ((0, mp - m), (0, 0)))
    num_classes = params["fc3_w"].shape[1]
    out = pl.pallas_call(
        _classifier_kernel,
        out_shape=jax.ShapeDtypeStruct((mp, num_classes), jnp.float32),
        grid=(1,),
        in_specs=[
            pl.BlockSpec((mp, d), lambda i: (0, 0)),
            pl.BlockSpec(params["fc1_w"].shape, lambda i: (0, 0)),
            pl.BlockSpec(params["fc1_b"].shape, lambda i: (0, 0)),
            pl.BlockSpec(params["fc2_w"].shape, lambda i: (0, 0)),
            pl.BlockSpec(params["fc2_b"].shape, lambda i: (0, 0)),
            pl.BlockSpec(params["fc3_w"].shape, lambda i: (0, 0)),
            pl.BlockSpec(params["fc3_b"].shape, lambda i: (0, 0)),
        ],
        out_specs=pl.BlockSpec((mp, num_classes), lambda i: (0, 0)),
    )(fp, params["fc1_w"], params["fc1_b"], params["fc2_w"], params["fc2_b"],
      params["fc3_w"], params["fc3_b"])
    return out[:m]


# ------------------------------------------------------------------
# Parameters (deterministic synthetic init; BatchNorm folded into conv weight+bias)
# TODO(synk): torchvision pretrained MobileNetV2 weights are not loadable in-script.
# ------------------------------------------------------------------

_IRES_CFG = [  # (expand t, out channels c, repeats n, stride s)
    (1, 16, 1, 1),
    (6, 24, 2, 2),
    (6, 32, 3, 2),
    (6, 64, 4, 2),
    (6, 96, 3, 1),
    (6, 160, 3, 2),
    (6, 320, 1, 1),
]


def init_params(key, metadata_dim=0, num_classes=2):
    keys = [key]

    def nxt():
        keys[0], sub = jax.random.split(keys[0])
        return sub

    def dense(cin, cout, dtype=jnp.bfloat16):
        w = (jax.random.normal(nxt(), (cin, cout), jnp.float32)
             * (1.0 / jnp.sqrt(float(cin)))).astype(dtype)
        b = jax.random.normal(nxt(), (1, cout), jnp.float32) * 0.01
        return w, b

    params = {}
    # stem: 3x3 conv stride 2, 3 -> 32, as im2col matrix; K padded 27 -> 32
    w27, b27 = dense(27, 32)
    params["stem_w"] = jnp.pad(w27, ((0, 5), (0, 0)))
    params["stem_b"] = b27

    blocks = []
    cin = 32
    for t, c, n, s in _IRES_CFG:
        for i in range(n):
            stride = s if i == 0 else 1
            hidden = cin * t
            blk = {"stride": stride, "cin": cin, "cout": c, "t": t}
            if t != 1:
                blk["expand_w"], blk["expand_b"] = dense(cin, hidden)
            blk["dw_w"] = (jax.random.normal(nxt(), (9, 1, hidden), jnp.float32)
                           * (1.0 / 3.0)).astype(jnp.bfloat16)
            blk["dw_b"] = jax.random.normal(nxt(), (1, hidden), jnp.float32) * 0.01
            blk["proj_w"], blk["proj_b"] = dense(hidden, c)
            blocks.append(blk)
            cin = c
    params["blocks"] = blocks

    params["head_w"], params["head_b"] = dense(320, 1280)
    base_output_size = 1280

    if metadata_dim > 0:
        params["meta_w"], params["meta_b"] = dense(metadata_dim, 64, dtype=jnp.float32)
        combined = base_output_size + 64
    else:
        combined = base_output_size

    params["fc1_w"], params["fc1_b"] = dense(combined, 512, dtype=jnp.float32)
    params["fc2_w"], params["fc2_b"] = dense(512, 128, dtype=jnp.float32)
    params["fc3_w"], params["fc3_b"] = dense(128, num_classes, dtype=jnp.float32)
    return params


# ------------------------------------------------------------------
# Forward pass (matches SkinLesionModel.forward, inference semantics)
# ------------------------------------------------------------------

def _stem_patches(x):
    """Wrapper-side im2col for the 3x3/stride-2 stem; K padded 27 -> 32 (bf16)."""
    nb, h, wd, cc = x.shape
    ho = (h - 1) // 2 + 1
    wo = (wd - 1) // 2 + 1
    xb = x.astype(jnp.bfloat16)
    xp = jnp.pad(xb, ((0, 0), (1, 1), (1, 1), (0, 0)))
    patches = [
        jax.lax.slice(xp, (0, ki, kj, 0),
                      (nb, ki + 2 * (ho - 1) + 1, kj + 2 * (wo - 1) + 1, cc),
                      (1, 2, 2, 1))
        for ki in range(3) for kj in range(3)
    ]
    p = jnp.concatenate(patches, axis=-1).reshape(nb * ho * wo, 9 * cc)
    p = jnp.pad(p, ((0, 0), (0, 32 - 9 * cc)))
    return p, ho, wo


def skin_lesion_forward(params, images_nchw, metadata=None):
    x = jnp.transpose(images_nchw, (0, 2, 3, 1))            # NCHW -> NHWC
    nb = x.shape[0]

    # stem: 3x3 conv stride 2, pad 1, ReLU6 (im2col + tiled MXU matmul)
    patches, ho, wo = _stem_patches(x)
    x = matmul_bias_act(patches, params["stem_w"], params["stem_b"], act="relu6")
    x = x.reshape(nb, ho, wo, 32)

    # inverted-residual blocks, each one fused pallas_call
    for blk in params["blocks"]:
        x = fused_inverted_residual(x, blk)

    # fused head 1x1 conv 320 -> 1280 + ReLU6 + global average pool
    feat = head_conv_gap(x, params["head_w"], params["head_b"])   # [N, 1280] f32

    # optional metadata branch (Linear + ReLU, Dropout = identity)
    if metadata is not None and "meta_w" in params:
        mfeat = matmul_bias_act(metadata.astype(jnp.float32),
                                params["meta_w"], params["meta_b"],
                                act="relu", out_dtype=jnp.float32)
        feat = jnp.concatenate([feat, mfeat], axis=1)

    # fused classifier MLP
    return classifier_head(feat, params)


# ------------------------------------------------------------------

if __name__ == "__main__":
    # Small stride-compatible image size (real model uses 224); metadata_dim=0,
    # num_classes=2 per the module defaults.
    image_size = 32
    batch = 2
    num_classes = 2

    key = jax.random.PRNGKey(0)
    pkey, xkey = jax.random.split(key)
    params = init_params(pkey, metadata_dim=0, num_classes=num_classes)

    images = jax.random.normal(xkey, (batch, 3, image_size, image_size), jnp.float32)

    logits = skin_lesion_forward(params, images)
    logits = jax.block_until_ready(logits)

    assert logits.shape == (batch, num_classes), logits.shape
    assert bool(jnp.all(jnp.isfinite(logits)))
    print("KERNEL_OK")
</pallas_src>

<mosaic_0001>
module attributes {stable_mosaic.version = 11 : i64} {
  func.func @_mm_kernel(%arg0: i32, %arg1: memref<512x32xbf16, #tpu.memory_space<vmem>>, %arg2: memref<32x32xbf16, #tpu.memory_space<vmem>>, %arg3: memref<1x32xf32, #tpu.memory_space<vmem>>, %arg4: memref<512x32xbf16, #tpu.memory_space<vmem>>) attributes {dimension_semantics = [#tpu.dimension_semantics<parallel>], iteration_bounds = array<i64: 1>, scalar_prefetch = 0 : i64, scratch_operands = 0 : i64, tpu.core_type = #tpu.core_type<tc>, window_params = [{transform_indices = @transform_0, window_bounds = array<i64: 512, 32>}, {pipeline_mode = #tpu.pipeline_mode<synchronous>, transform_indices = @transform_1, window_bounds = array<i64: 32, 32>}, {pipeline_mode = #tpu.pipeline_mode<synchronous>, transform_indices = @transform_2, window_bounds = array<i64: 1, 32>}, {transform_indices = @transform_3, window_bounds = array<i64: 512, 32>}]} {
    %c0 = arith.constant 0 : index
    %c0_0 = arith.constant 0 : index
    %0 = vector.load %arg1[%c0, %c0_0] : memref<512x32xbf16, #tpu.memory_space<vmem>>, vector<512x32xbf16>
    %c0_1 = arith.constant 0 : index
    %c0_2 = arith.constant 0 : index
    %1 = vector.load %arg2[%c0_1, %c0_2] : memref<32x32xbf16, #tpu.memory_space<vmem>>, vector<32x32xbf16>
    %cst = arith.constant dense<0.000000e+00> : vector<512x32xf32>
    %2 = tpu.matmul %0, %1, %cst {dimension_numbers = #tpu.dot_dimension_numbers<[1], [0], [0], [1], [0, 0, 1, 1], [], []>} : vector<512x32xbf16>, vector<32x32xbf16>, vector<512x32xf32> -> vector<512x32xf32>
    %c0_3 = arith.constant 0 : index
    %c0_4 = arith.constant 0 : index
    %3 = vector.load %arg3[%c0_3, %c0_4] : memref<1x32xf32, #tpu.memory_space<vmem>>, vector<1x32xf32>
    %4 = vector.broadcast %3 : vector<1x32xf32> to vector<512x32xf32>
    %5 = arith.addf %2, %4 : vector<512x32xf32>
    %cst_5 = arith.constant 0.000000e+00 : f32
    %6 = vector.broadcast %cst_5 : f32 to vector<512x32xf32>
    %7 = arith.maximumf %5, %6 : vector<512x32xf32>
    %cst_6 = arith.constant 6.000000e+00 : f32
    %8 = vector.broadcast %cst_6 : f32 to vector<512x32xf32>
    %9 = arith.minimumf %7, %8 : vector<512x32xf32>
    %10 = arith.truncf %9 : vector<512x32xf32> to vector<512x32xbf16>
    %c0_7 = arith.constant 0 : index
    %c0_8 = arith.constant 0 : index
    %11 = vector.load %arg4[%c0_7, %c0_8] : memref<512x32xbf16, #tpu.memory_space<vmem>>, vector<512x32xbf16>
    tpu.vector_store %arg4[%c0_7, %c0_8], %10 {strides = array<i32>} : memref<512x32xbf16, #tpu.memory_space<vmem>>, vector<512x32xbf16>,
    return
  }
  func.func @transform_0(%arg0: i32) -> (i32, i32) {
    %c0_i32 = arith.constant 0 : i32
    %c0_i32_0 = arith.constant 0 : i32
    return %arg0, %c0_i32 : i32, i32
  }
  func.func @transform_1(%arg0: i32) -> (i32, i32) {
    %c0_i32 = arith.constant 0 : i32
    %c0_i32_0 = arith.constant 0 : i32
    %c0_i32_1 = arith.constant 0 : i32
    return %c0_i32, %c0_i32_0 : i32, i32
  }
  func.func @transform_2(%arg0: i32) -> (i32, i32) {
    %c0_i32 = arith.constant 0 : i32
    %c0_i32_0 = arith.constant 0 : i32
    %c0_i32_1 = arith.constant 0 : i32
    return %c0_i32, %c0_i32_0 : i32, i32
  }
  func.func @transform_3(%arg0: i32) -> (i32, i32) {
    %c0_i32 = arith.constant 0 : i32
    %c0_i32_0 = arith.constant 0 : i32
    return %arg0, %c0_i32 : i32, i32
  }
}

</mosaic_0001>

<bundles_post_ra>
// kernel: tpu_custom_call.1
= control target key start
LH: loop header
LB: loop body
LE: loop exit
PB: predicated region body
PF: predicated region fallthrough
CT: control target
= control target key end

     0   :  { %vm262_vm0 = vcmask 261120   ;;  %vm1032_vm1 = vcmask 257024   ;;  %s1915_s1 = inlined_call_operand.vmem [shape: bf16[32,32], index: 1, kind: input, shape index: {}]   ;;  %s1916_s0 = inlined_call_operand.vmem [shape: bf16[512,32], index: 0, kind: input, shape index: {}]   ;;  %s1917_s2 = inlined_call_operand.vmem [shape: f32[1,32], index: 2, kind: input, shape index: {}]   ;;  %s1918_s3 = inlined_call_operand.vmem [shape: bf16[512,32], index: 3, kind: output, shape index: {}]  }
   0x1   :  { %v1402_v0 = vld [vmem:[%s1915_s1] sm:$0xff]   ;;  %v1403_v1 = vld [vmem:[%s1915_s1 + $0x8] sm:$0xff]   ;;  %v1408_v6 = vld [vmem:[%s1916_s0 + $0x10] sm:$0xff]  }
   0x2   :  { %1330 = vmatprep.subr.bf16.mxu0 %v1402_v0  ;;  %1398 = vmatprep.subr.bf16.mxu1 %v1402_v0  ;;  %v1404_v2 = vld [vmem:[%s1916_s0] sm:$0xff]   ;;  %v1406_v4 = vld [vmem:[%s1916_s0 + $0x8] sm:$0xff]   ;;  %v1409_v7 = vld [vmem:[%s1916_s0 + $0x90] sm:$0xff]  }
   0x3   :  { %1331 = vmatpush3.bf16.msra.mxu0 %v1402_v0  ;;  %1400 = vmatpush3.bf16.msra.mxu1 %v1402_v0  ;;  %v1405_v3 = vld [vmem:[%s1916_s0 + $0x80] sm:$0xff]   ;;  %v1407_v5 = vld [vmem:[%s1916_s0 + $0x88] sm:$0xff]   ;;  %v1410_v8 = vld [vmem:[%s1916_s0 + $0x18] sm:$0xff]  }
   0x4   :  { %1332 = vmatprep.subr.bf16.mxu0 %v1403_v1  ;;  %1399 = vmatprep.subr.bf16.mxu1 %v1403_v1  ;;  %v1411_v9 = vld [vmem:[%s1916_s0 + $0x98] sm:$0xff]   ;;  %v1412_v10 = vld [vmem:[%s1916_s0 + $0x20] sm:$0xff]   ;;  %v1414_v12 = vld [vmem:[%s1916_s0 + $0x28] sm:$0xff]  }
   0x5   :  { %1334 = vmatprep.mubr.msk.bf16.mxu0 %vm262_vm0, %v1404_v2  ;;  %1366 = vmatprep.mubr.msk.bf16.mxu1 %vm262_vm0, %v1405_v3  ;;  %v1413_v11 = vld [vmem:[%s1916_s0 + $0xa0] sm:$0xff]   ;;  %v1415_v13 = vld [vmem:[%s1916_s0 + $0xa8] sm:$0xff]   ;;  %v1416_v14 = vld [vmem:[%s1916_s0 + $0x30] sm:$0xff]  }
   0x6   :  { %v1417_v15 = vld [vmem:[%s1916_s0 + $0xb0] sm:$0xff]   ;;  %v1418_v16 = vld [vmem:[%s1916_s0 + $0x38] sm:$0xff]   ;;  %v1420_v18 = vld [vmem:[%s1916_s0 + $0x40] sm:$0xff]  }
   0x7   :  { %1333 = vmatpush3.bf16.msra.mxu0 %v1403_v1  ;;  %1401 = vmatpush3.bf16.msra.mxu1 %v1403_v1  ;;  %v1419_v17 = vld [vmem:[%s1916_s0 + $0xb8] sm:$0xff]   ;;  %v1421_v19 = vld [vmem:[%s1916_s0 + $0xc0] sm:$0xff]   ;;  %v1422_v20 = vld [vmem:[%s1916_s0 + $0x48] sm:$0xff]  }
   0x8   :  { %v1423_v21 = vld [vmem:[%s1916_s0 + $0xc8] sm:$0xff]   ;;  %v1424_v22 = vld [vmem:[%s1916_s0 + $0x50] sm:$0xff]   ;;  %v1426_v24 = vld [vmem:[%s1916_s0 + $0x58] sm:$0xff]  }
   0x9   :  { %v1425_v23 = vld [vmem:[%s1916_s0 + $0xd0] sm:$0xff]   ;;  %v1427_v25 = vld [vmem:[%s1916_s0 + $0xd8] sm:$0xff]   ;;  %v1428_v26 = vld [vmem:[%s1916_s0 + $0x60] sm:$0xff]  }
   0xa   :  { %1335 = vmatmul.mubr.msk.bf16.vlgmr.msra.gmra.mrb[0].mxu0 %vm262_vm0, %v1406_v4  ;;  %1367 = vmatmul.mubr.msk.bf16.vlgmr.msra.gmra.mrb[0].mxu1 %vm262_vm0, %v1407_v5  ;;  %v1429_v27 = vld [vmem:[%s1916_s0 + $0xe0] sm:$0xff]   ;;  %v1430_v28 = vld [vmem:[%s1916_s0 + $0x68] sm:$0xff]   ;;  %v1432_v30 = vld [vmem:[%s1916_s0 + $0x70] sm:$0xff]  }
   0xb   :  { %1338 = vmatprep.mubr.msk.bf16.mxu0 %vm262_vm0, %v1408_v6  ;;  %1370 = vmatprep.mubr.msk.bf16.mxu1 %vm262_vm0, %v1409_v7  ;;  %v1431_v29 = vld [vmem:[%s1916_s0 + $0xe8] sm:$0xff]   ;;  %v1433_v31 = vld [vmem:[%s1916_s0 + $0xf0] sm:$0xff]   ;;  %v1434_v32 = vld [vmem:[%s1916_s0 + $0x78] sm:$0xff]  }
   0xc   :  { %v1435_v33 = vld [vmem:[%s1916_s0 + $0xf8] sm:$0xff]   ;;  %v1593_v34 = vld [vmem:[%s1917_s2] ss:$0 sm:$0xff] }
  0x12   :  { %1339 = vmatmul.mubr.msk.bf16.gmra.mrb[4].mxu0 %vm262_vm0, %v1410_v8  ;;  %1371 = vmatmul.mubr.msk.bf16.gmra.mrb[4].mxu1 %vm262_vm0, %v1411_v9 }
  0x13   :  { %1342 = vmatprep.mubr.msk.bf16.mxu0 %vm262_vm0, %v1412_v10  ;;  %1374 = vmatprep.mubr.msk.bf16.mxu1 %vm262_vm0, %v1413_v11 }
  0x1a   :  { %1343 = vmatmul.mubr.msk.bf16.gmra.mrb[8].mxu0 %vm262_vm0, %v1414_v12  ;;  %1375 = vmatmul.mubr.msk.bf16.gmra.mrb[8].mxu1 %vm262_vm0, %v1415_v13 }
  0x1b   :  { %1346 = vmatprep.mubr.msk.bf16.mxu0 %vm262_vm0, %v1416_v14  ;;  %1378 = vmatprep.mubr.msk.bf16.mxu1 %vm262_vm0, %v1417_v15 }
  0x22   :  { %1347 = vmatmul.mubr.msk.bf16.gmra.mrb[12].mxu0 %vm262_vm0, %v1418_v16  ;;  %1379 = vmatmul.mubr.msk.bf16.gmra.mrb[12].mxu1 %vm262_vm0, %v1419_v17 }
  0x23   :  { %1350 = vmatprep.mubr.msk.bf16.mxu0 %vm262_vm0, %v1420_v18  ;;  %1382 = vmatprep.mubr.msk.bf16.mxu1 %vm262_vm0, %v1421_v19 }
  0x2a   :  { %1351 = vmatmul.mubr.msk.bf16.gmra.mrb[16].mxu0 %vm262_vm0, %v1422_v20  ;;  %1383 = vmatmul.mubr.msk.bf16.gmra.mrb[16].mxu1 %vm262_vm0, %v1423_v21 }
  0x2b   :  { %1354 = vmatprep.mubr.msk.bf16.mxu0 %vm262_vm0, %v1424_v22  ;;  %1386 = vmatprep.mubr.msk.bf16.mxu1 %vm262_vm0, %v1425_v23 }
  0x32   :  { %1355 = vmatmul.mubr.msk.bf16.gmra.mrb[20].mxu0 %vm262_vm0, %v1426_v24  ;;  %1387 = vmatmul.mubr.msk.bf16.gmra.mrb[20].mxu1 %vm262_vm0, %v1427_v25 }
  0x33   :  { %1358 = vmatprep.mubr.msk.bf16.mxu0 %vm262_vm0, %v1428_v26  ;;  %1390 = vmatprep.mubr.msk.bf16.mxu1 %vm262_vm0, %v1429_v27 }
  0x3a   :  { %1359 = vmatmul.mubr.msk.bf16.gmra.mrb[24].mxu0 %vm262_vm0, %v1430_v28  ;;  %1391 = vmatmul.mubr.msk.bf16.gmra.mrb[24].mxu1 %vm262_vm0, %v1431_v29 }
  0x3b   :  { %1362 = vmatprep.mubr.msk.bf16.mxu0 %vm262_vm0, %v1432_v30  ;;  %1394 = vmatprep.mubr.msk.bf16.mxu1 %vm262_vm0, %v1433_v31 }
  0x42   :  { %1363 = vmatmul.mubr.msk.bf16.gmra.mrb[28].mxu0 %vm262_vm0, %v1434_v32  ;;  %1395 = vmatmul.mubr.msk.bf16.gmra.mrb[28].mxu1 %vm262_vm0, %v1435_v33 }
  0xdd   :  { %v1336_v35 = vpop.f32.mrb[0].mxu0  ;;  %v1368_v36 = vpop.f32.mrb[0].mxu1 }
  0xde   :  { %v402_v37 = vadd.f32 %v1336_v35, %v1593_v34  ;;  %v530_v38 = vadd.f32 %v1368_v36, %v1593_v34  ;;  %v393_v39 = vpop.f32.mrb[1].mxu0  ;;  %v521_v40 = vpop.f32.mrb[1].mxu1 }
  0xdf   :  { %v394_v41 = vadd.f32 %v1593_v34, %v393_v39  ;;  %v522_v42 = vadd.f32 %v1593_v34, %v521_v40  ;;  %v1337_v43 = vpop.f32.mrb[2].mxu0  ;;  %v1369_v44 = vpop.f32.mrb[2].mxu1 }
  0xe0   :  { %v650_v45 = vmax.f32 %v402_v37, 0.0  ;;  %v682_v46 = vmax.f32 %v530_v38, 0.0  ;;  %v405_v47 = vadd.f32 %v1337_v43, %v1593_v34  ;;  %v533_v48 = vadd.f32 %v1369_v44, %v1593_v34  ;;  %v396_v49 = vpop.f32.mrb[3].mxu0  ;;  %v524_v50 = vpop.f32.mrb[3].mxu1 }
  0xe1   :  { %v648_v51 = vmax.f32 %v394_v41, 0.0  ;;  %v680_v52 = vmax.f32 %v522_v42, 0.0  ;;  %v397_v53 = vadd.f32 %v1593_v34, %v396_v49  ;;  %v525_v54 = vadd.f32 %v1593_v34, %v524_v50 }
  0xe2   :  { %v714_v55 = vmin.f32 %v650_v45, 6.0  ;;  %v746_v56 = vmin.f32 %v682_v46, 6.0  ;;  %v651_v57 = vmax.f32 %v405_v47, 0.0  ;;  %v683_v58 = vmax.f32 %v533_v48, 0.0 }
  0xe3   :  { %v712_v59 = vmin.f32 %v648_v51, 6.0  ;;  %v744_v60 = vmin.f32 %v680_v52, 6.0  ;;  %v649_v61 = vmax.f32 %v397_v53, 0.0  ;;  %v681_v62 = vmax.f32 %v525_v54, 0.0 }
  0xe4   :  { %v1234_v63 = vpack.c.bf16 %v714_v55, %v714_v55  ;;  %v1266_v0 = vpack.c.bf16 %v746_v56, %v746_v56  ;;  %v715_v1 = vmin.f32 %v651_v57, 6.0  ;;  %v747_v2 = vmin.f32 %v683_v58, 6.0 }
  0xe5   :  { %v1232_v3 = vpack.c.bf16 %v712_v59, %v712_v59  ;;  %v1264_v4 = vpack.c.bf16 %v744_v60, %v744_v60  ;;  %v713_v5 = vmin.f32 %v649_v61, 6.0  ;;  %v745_v6 = vmin.f32 %v681_v62, 6.0  ;;  %v1340_v7 = vpop.f32.mrb[4].mxu0  ;;  %v1372_v8 = vpop.f32.mrb[4].mxu1 }
  0xe6   :  { %1035 = vst.msk [vmem:[%s1918_s3 + $0x8] sm:$0xf] %vm1032_vm1, %v1234_v63  ;;  %1067 = vst.msk [vmem:[%s1918_s3 + $0x88] sm:$0xf] %vm1032_vm1, %v1266_v0  ;;  %v1235_v9 = vpack.c.bf16 %v715_v1, %v715_v1  ;;  %v1267_v10 = vpack.c.bf16 %v747_v2, %v747_v2  ;;  %v418_v11 = vadd.f32 %v1340_v7, %v1593_v34  ;;  %v409_v13 = vpop.f32.mrb[5].mxu0  ;;  %v537_v14 = vpop.f32.mrb[5].mxu1 }
  0xe7   :  { %v546_v12 = vadd.f32 %v1372_v8, %v1593_v34  ;;  %1033 = vst.msk [vmem:[%s1918_s3] sm:$0xf] %vm1032_vm1, %v1232_v3  ;;  %1065 = vst.msk [vmem:[%s1918_s3 + $0x80] sm:$0xf] %vm1032_vm1, %v1264_v4  ;;  %v1233_v15 = vpack.c.bf16 %v713_v5, %v713_v5  ;;  %v1265_v16 = vpack.c.bf16 %v745_v6, %v745_v6  ;;  %v1341_v19 = vpop.f32.mrb[6].mxu0  ;;  %v1373_v20 = vpop.f32.mrb[6].mxu1 }
  0xe8   :  { %v410_v17 = vadd.f32 %v1593_v34, %v409_v13  ;;  %v538_v18 = vadd.f32 %v1593_v34, %v537_v14  ;;  %1036 = vst.msk [vmem:[%s1918_s3 + $0xc] sm:$0xf] %vm1032_vm1, %v1235_v9  ;;  %1068 = vst.msk [vmem:[%s1918_s3 + $0x8c] sm:$0xf] %vm1032_vm1, %v1267_v10  ;;  %v654_v21 = vmax.f32 %v418_v11, 0.0  ;;  %v421_v23 = vadd.f32 %v1341_v19, %v1593_v34  ;;  %v412_v25 = vpop.f32.mrb[7].mxu0 }
  0xe9   :  { %v686_v22 = vmax.f32 %v546_v12, 0.0  ;;  %v549_v24 = vadd.f32 %v1373_v20, %v1593_v34  ;;  %v540_v26 = vpop.f32.mrb[7].mxu1  ;;  %1034 = vst.msk [vmem:[%s1918_s3 + $0x4] sm:$0xf] %vm1032_vm1, %v1233_v15  ;;  %1066 = vst.msk [vmem:[%s1918_s3 + $0x84] sm:$0xf] %vm1032_vm1, %v1265_v16  ;;  %v413_v29 = vadd.f32 %v1593_v34, %v412_v25 }
  0xea   :  { %v652_v27 = vmax.f32 %v410_v17, 0.0  ;;  %v684_v28 = vmax.f32 %v538_v18, 0.0  ;;  %v541_v30 = vadd.f32 %v1593_v34, %v540_v26  ;;  %v718_v31 = vmin.f32 %v654_v21, 6.0 }
  0xeb   :  { %v750_v32 = vmin.f32 %v686_v22, 6.0  ;;  %v655_v33 = vmax.f32 %v421_v23, 0.0  ;;  %v687_v35 = vmax.f32 %v549_v24, 0.0  ;;  %v653_v38 = vmax.f32 %v413_v29, 0.0 }
  0xec   :  { %v716_v36 = vmin.f32 %v652_v27, 6.0  ;;  %v748_v37 = vmin.f32 %v684_v28, 6.0  ;;  %v685_v39 = vmax.f32 %v541_v30, 0.0  ;;  %v1238_v40 = vpack.c.bf16 %v718_v31, %v718_v31 }
  0xed   :  { %v1270_v41 = vpack.c.bf16 %v750_v32, %v750_v32  ;;  %v719_v42 = vmin.f32 %v655_v33, 6.0  ;;  %v751_v43 = vmin.f32 %v687_v35, 6.0  ;;  %v717_v46 = vmin.f32 %v653_v38, 6.0  ;;  %v1344_v48 = vpop.f32.mrb[8].mxu0  ;;  %v1376_v49 = vpop.f32.mrb[8].mxu1 }
  0xee   :  { %v1236_v44 = vpack.c.bf16 %v716_v36, %v716_v36  ;;  %v1268_v45 = vpack.c.bf16 %v748_v37, %v748_v37  ;;  %v749_v47 = vmin.f32 %v685_v39, 6.0  ;;  %1039 = vst.msk [vmem:[%s1918_s3 + $0x18] sm:$0xf] %vm1032_vm1, %v1238_v40  ;;  %v434_v52 = vadd.f32 %v1344_v48, %v1593_v34  ;;  %v425_v54 = vpop.f32.mrb[9].mxu0  ;;  %v553_v55 = vpop.f32.mrb[9].mxu1 }
  0xef   :  { %1071 = vst.msk [vmem:[%s1918_s3 + $0x98] sm:$0xf] %vm1032_vm1, %v1270_v41  ;;  %v1239_v50 = vpack.c.bf16 %v719_v42, %v719_v42  ;;  %v1271_v51 = vpack.c.bf16 %v751_v43, %v751_v43  ;;  %v562_v53 = vadd.f32 %v1376_v49, %v1593_v34  ;;  %v1237_v56 = vpack.c.bf16 %v717_v46, %v717_v46  ;;  %v1345_v60 = vpop.f32.mrb[10].mxu0  ;;  %v1377_v61 = vpop.f32.mrb[10].mxu1 }
  0xf0   :  { %1037 = vst.msk [vmem:[%s1918_s3 + $0x10] sm:$0xf] %vm1032_vm1, %v1236_v44  ;;  %1069 = vst.msk [vmem:[%s1918_s3 + $0x90] sm:$0xf] %vm1032_vm1, %v1268_v45  ;;  %v1269_v57 = vpack.c.bf16 %v749_v47, %v749_v47  ;;  %v426_v58 = vadd.f32 %v1593_v34, %v425_v54  ;;  %v554_v59 = vadd.f32 %v1593_v34, %v553_v55  ;;  %v658_v62 = vmax.f32 %v434_v52, 0.0  ;;  %v428_v2 = vpop.f32.mrb[11].mxu0 }
  0xf1   :  { %1040 = vst.msk [vmem:[%s1918_s3 + $0x1c] sm:$0xf] %vm1032_vm1, %v1239_v50  ;;  %1072 = vst.msk [vmem:[%s1918_s3 + $0x9c] sm:$0xf] %vm1032_vm1, %v1271_v51  ;;  %v690_v63 = vmax.f32 %v562_v53, 0.0  ;;  %v437_v0 = vadd.f32 %v1345_v60, %v1593_v34  ;;  %v565_v1 = vadd.f32 %v1377_v61, %v1593_v34  ;;  %v556_v3 = vpop.f32.mrb[11].mxu1  ;;  %v429_v6 = vadd.f32 %v1593_v34, %v428_v2 }
  0xf2   :  { %1038 = vst.msk [vmem:[%s1918_s3 + $0x14] sm:$0xf] %vm1032_vm1, %v1237_v56  ;;  %1070 = vst.msk [vmem:[%s1918_s3 + $0x94] sm:$0xf] %vm1032_vm1, %v1269_v57  ;;  %v656_v4 = vmax.f32 %v426_v58, 0.0  ;;  %v688_v5 = vmax.f32 %v554_v59, 0.0  ;;  %v557_v7 = vadd.f32 %v1593_v34, %v556_v3 }
  0xf3   :  { %v722_v8 = vmin.f32 %v658_v62, 6.0  ;;  %v754_v9 = vmin.f32 %v690_v63, 6.0  ;;  %v659_v10 = vmax.f32 %v437_v0, 0.0  ;;  %v691_v11 = vmax.f32 %v565_v1, 0.0 }
  0xf4   :  { %v720_v12 = vmin.f32 %v656_v4, 6.0  ;;  %v752_v13 = vmin.f32 %v688_v5, 6.0  ;;  %v657_v14 = vmax.f32 %v429_v6, 0.0  ;;  %v689_v15 = vmax.f32 %v557_v7, 0.0 }
  0xf5   :  { %v1242_v16 = vpack.c.bf16 %v722_v8, %v722_v8  ;;  %v1274_v17 = vpack.c.bf16 %v754_v9, %v754_v9  ;;  %v723_v18 = vmin.f32 %v659_v10, 6.0  ;;  %v755_v19 = vmin.f32 %v691_v11, 6.0  ;;  %v1348_v24 = vpop.f32.mrb[12].mxu0  ;;  %v1380_v25 = vpop.f32.mrb[12].mxu1 }
  0xf6   :  { %v1240_v20 = vpack.c.bf16 %v720_v12, %v720_v12  ;;  %v1272_v21 = vpack.c.bf16 %v752_v13, %v752_v13  ;;  %v721_v22 = vmin.f32 %v657_v14, 6.0  ;;  %v753_v23 = vmin.f32 %v689_v15, 6.0  ;;  %v441_v30 = vpop.f32.mrb[13].mxu0  ;;  %v569_v31 = vpop.f32.mrb[13].mxu1 }
  0xf7   :  { %1043 = vst.msk [vmem:[%s1918_s3 + $0x28] sm:$0xf] %vm1032_vm1, %v1242_v16  ;;  %1075 = vst.msk [vmem:[%s1918_s3 + $0xa8] sm:$0xf] %vm1032_vm1, %v1274_v17  ;;  %v1243_v26 = vpack.c.bf16 %v723_v18, %v723_v18  ;;  %v1275_v27 = vpack.c.bf16 %v755_v19, %v755_v19  ;;  %v450_v28 = vadd.f32 %v1348_v24, %v1593_v34  ;;  %v1349_v37 = vpop.f32.mrb[14].mxu0  ;;  %v1381_v38 = vpop.f32.mrb[14].mxu1 }
  0xf8   :  { %v578_v29 = vadd.f32 %v1380_v25, %v1593_v34  ;;  %1041 = vst.msk [vmem:[%s1918_s3 + $0x20] sm:$0xf] %vm1032_vm1, %v1240_v20  ;;  %1073 = vst.msk [vmem:[%s1918_s3 + $0xa0] sm:$0xf] %vm1032_vm1, %v1272_v21  ;;  %v1241_v32 = vpack.c.bf16 %v721_v22, %v721_v22  ;;  %v1273_v33 = vpack.c.bf16 %v753_v23, %v753_v23  ;;  %v444_v43 = vpop.f32.mrb[15].mxu0  ;;  %v572_v44 = vpop.f32.mrb[15].mxu1 }
  0xf9   :  { %v442_v35 = vadd.f32 %v1593_v34, %v441_v30  ;;  %v570_v36 = vadd.f32 %v1593_v34, %v569_v31  ;;  %1044 = vst.msk [vmem:[%s1918_s3 + $0x2c] sm:$0xf] %vm1032_vm1, %v1243_v26  ;;  %1076 = vst.msk [vmem:[%s1918_s3 + $0xac] sm:$0xf] %vm1032_vm1, %v1275_v27  ;;  %v662_v39 = vmax.f32 %v450_v28, 0.0  ;;  %v453_v41 = vadd.f32 %v1349_v37, %v1593_v34 }
  0xfa   :  { %v694_v40 = vmax.f32 %v578_v29, 0.0  ;;  %v581_v42 = vadd.f32 %v1381_v38, %v1593_v34  ;;  %1042 = vst.msk [vmem:[%s1918_s3 + $0x24] sm:$0xf] %vm1032_vm1, %v1241_v32  ;;  %1074 = vst.msk [vmem:[%s1918_s3 + $0xa4] sm:$0xf] %vm1032_vm1, %v1273_v33  ;;  %v445_v47 = vadd.f32 %v1593_v34, %v444_v43  ;;  %v573_v48 = vadd.f32 %v1593_v34, %v572_v44 }
  0xfb   :  { %v660_v45 = vmax.f32 %v442_v35, 0.0  ;;  %v692_v46 = vmax.f32 %v570_v36, 0.0  ;;  %v726_v49 = vmin.f32 %v662_v39, 6.0  ;;  %v663_v51 = vmax.f32 %v453_v41, 0.0 }
  0xfc   :  { %v758_v50 = vmin.f32 %v694_v40, 6.0  ;;  %v695_v52 = vmax.f32 %v581_v42, 0.0  ;;  %v661_v55 = vmax.f32 %v445_v47, 0.0  ;;  %v693_v56 = vmax.f32 %v573_v48, 0.0 }
  0xfd   :  { %v724_v53 = vmin.f32 %v660_v45, 6.0  ;;  %v756_v54 = vmin.f32 %v692_v46, 6.0  ;;  %v1246_v57 = vpack.c.bf16 %v726_v49, %v726_v49  ;;  %v727_v59 = vmin.f32 %v663_v51, 6.0  ;;  %v1352_v1 = vpop.f32.mrb[16].mxu0  ;;  %v1384_v2 = vpop.f32.mrb[16].mxu1 }
  0xfe   :  { %v1278_v58 = vpack.c.bf16 %v758_v50, %v758_v50  ;;  %v759_v60 = vmin.f32 %v695_v52, 6.0  ;;  %v725_v63 = vmin.f32 %v661_v55, 6.0  ;;  %v757_v0 = vmin.f32 %v693_v56, 6.0  ;;  %v457_v7 = vpop.f32.mrb[17].mxu0  ;;  %v585_v8 = vpop.f32.mrb[17].mxu1 }
  0xff   :  { %v1244_v61 = vpack.c.bf16 %v724_v53, %v724_v53  ;;  %v1276_v62 = vpack.c.bf16 %v756_v54, %v756_v54  ;;  %1047 = vst.msk [vmem:[%s1918_s3 + $0x38] sm:$0xf] %vm1032_vm1, %v1246_v57  ;;  %v1247_v3 = vpack.c.bf16 %v727_v59, %v727_v59  ;;  %v466_v5 = vadd.f32 %v1352_v1, %v1593_v34  ;;  %v1353_v13 = vpop.f32.mrb[18].mxu0  ;;  %v1385_v14 = vpop.f32.mrb[18].mxu1 }
 0x100   :  { %1079 = vst.msk [vmem:[%s1918_s3 + $0xb8] sm:$0xf] %vm1032_vm1, %v1278_v58  ;;  %v1279_v4 = vpack.c.bf16 %v759_v60, %v759_v60  ;;  %v594_v6 = vadd.f32 %v1384_v2, %v1593_v34  ;;  %v1245_v9 = vpack.c.bf16 %v725_v63, %v725_v63  ;;  %v1277_v10 = vpack.c.bf16 %v757_v0, %v757_v0  ;;  %v460_v19 = vpop.f32.mrb[19].mxu0  ;;  %v588_v20 = vpop.f32.mrb[19].mxu1 }
 0x101   :  { %1045 = vst.msk [vmem:[%s1918_s3 + $0x30] sm:$0xf] %vm1032_vm1, %v1244_v61  ;;  %1077 = vst.msk [vmem:[%s1918_s3 + $0xb0] sm:$0xf] %vm1032_vm1, %v1276_v62  ;;  %v458_v11 = vadd.f32 %v1593_v34, %v457_v7  ;;  %v586_v12 = vadd.f32 %v1593_v34, %v585_v8  ;;  %v666_v15 = vmax.f32 %v466_v5, 0.0  ;;  %v469_v17 = vadd.f32 %v1353_v13, %v1593_v34 }
 0x102   :  { %1048 = vst.msk [vmem:[%s1918_s3 + $0x3c] sm:$0xf] %vm1032_vm1, %v1247_v3  ;;  %1080 = vst.msk [vmem:[%s1918_s3 + $0xbc] sm:$0xf] %vm1032_vm1, %v1279_v4  ;;  %v698_v16 = vmax.f32 %v594_v6, 0.0  ;;  %v597_v18 = vadd.f32 %v1385_v14, %v1593_v34  ;;  %v461_v23 = vadd.f32 %v1593_v34, %v460_v19  ;;  %v589_v24 = vadd.f32 %v1593_v34, %v588_v20 }
 0x103   :  { %1046 = vst.msk [vmem:[%s1918_s3 + $0x34] sm:$0xf] %vm1032_vm1, %v1245_v9  ;;  %1078 = vst.msk [vmem:[%s1918_s3 + $0xb4] sm:$0xf] %vm1032_vm1, %v1277_v10  ;;  %v664_v21 = vmax.f32 %v458_v11, 0.0  ;;  %v696_v22 = vmax.f32 %v586_v12, 0.0 }
 0x104   :  { %v730_v25 = vmin.f32 %v666_v15, 6.0  ;;  %v762_v26 = vmin.f32 %v698_v16, 6.0  ;;  %v667_v27 = vmax.f32 %v469_v17, 0.0  ;;  %v699_v28 = vmax.f32 %v597_v18, 0.0 }
 0x105   :  { %v728_v29 = vmin.f32 %v664_v21, 6.0  ;;  %v760_v30 = vmin.f32 %v696_v22, 6.0  ;;  %v665_v31 = vmax.f32 %v461_v23, 0.0  ;;  %v697_v32 = vmax.f32 %v589_v24, 0.0  ;;  %v1356_v42 = vpop.f32.mrb[20].mxu0  ;;  %v1388_v43 = vpop.f32.mrb[20].mxu1 }
 0x106   :  { %v1250_v33 = vpack.c.bf16 %v730_v25, %v730_v25  ;;  %v1282_v35 = vpack.c.bf16 %v762_v26, %v762_v26  ;;  %v731_v36 = vmin.f32 %v667_v27, 6.0  ;;  %v763_v37 = vmin.f32 %v699_v28, 6.0  ;;  %v473_v48 = vpop.f32.mrb[21].mxu0  ;;  %v601_v49 = vpop.f32.mrb[21].mxu1 }
 0x107   :  { %v1248_v38 = vpack.c.bf16 %v728_v29, %v728_v29  ;;  %v1280_v39 = vpack.c.bf16 %v760_v30, %v760_v30  ;;  %v729_v40 = vmin.f32 %v665_v31, 6.0  ;;  %v761_v41 = vmin.f32 %v697_v32, 6.0  ;;  %v1357_v54 = vpop.f32.mrb[22].mxu0  ;;  %v1389_v55 = vpop.f32.mrb[22].mxu1 }
 0x108   :  { %1051 = vst.msk [vmem:[%s1918_s3 + $0x48] sm:$0xf] %vm1032_vm1, %v1250_v33  ;;  %1083 = vst.msk [vmem:[%s1918_s3 + $0xc8] sm:$0xf] %vm1032_vm1, %v1282_v35  ;;  %v1251_v44 = vpack.c.bf16 %v731_v36, %v731_v36  ;;  %v1283_v45 = vpack.c.bf16 %v763_v37, %v763_v37  ;;  %v482_v46 = vadd.f32 %v1356_v42, %v1593_v34  ;;  %v476_v60 = vpop.f32.mrb[23].mxu0  ;;  %v604_v61 = vpop.f32.mrb[23].mxu1 }
 0x109   :  { %v610_v47 = vadd.f32 %v1388_v43, %v1593_v34  ;;  %1049 = vst.msk [vmem:[%s1918_s3 + $0x40] sm:$0xf] %vm1032_vm1, %v1248_v38  ;;  %1081 = vst.msk [vmem:[%s1918_s3 + $0xc0] sm:$0xf] %vm1032_vm1, %v1280_v39  ;;  %v1249_v50 = vpack.c.bf16 %v729_v40, %v729_v40  ;;  %v1281_v51 = vpack.c.bf16 %v761_v41, %v761_v41 }
 0x10a   :  { %v474_v52 = vadd.f32 %v1593_v34, %v473_v48  ;;  %v602_v53 = vadd.f32 %v1593_v34, %v601_v49  ;;  %1052 = vst.msk [vmem:[%s1918_s3 + $0x4c] sm:$0xf] %vm1032_vm1, %v1251_v44  ;;  %1084 = vst.msk [vmem:[%s1918_s3 + $0xcc] sm:$0xf] %vm1032_vm1, %v1283_v45  ;;  %v670_v56 = vmax.f32 %v482_v46, 0.0  ;;  %v485_v58 = vadd.f32 %v1357_v54, %v1593_v34 }
 0x10b   :  { %v702_v57 = vmax.f32 %v610_v47, 0.0  ;;  %v613_v59 = vadd.f32 %v1389_v55, %v1593_v34  ;;  %1050 = vst.msk [vmem:[%s1918_s3 + $0x44] sm:$0xf] %vm1032_vm1, %v1249_v50  ;;  %1082 = vst.msk [vmem:[%s1918_s3 + $0xc4] sm:$0xf] %vm1032_vm1, %v1281_v51  ;;  %v477_v0 = vadd.f32 %v1593_v34, %v476_v60  ;;  %v605_v1 = vadd.f32 %v1593_v34, %v604_v61 }
 0x10c   :  { %v668_v62 = vmax.f32 %v474_v52, 0.0  ;;  %v700_v63 = vmax.f32 %v602_v53, 0.0  ;;  %v734_v2 = vmin.f32 %v670_v56, 6.0  ;;  %v671_v4 = vmax.f32 %v485_v58, 0.0 }
 0x10d   :  { %v766_v3 = vmin.f32 %v702_v57, 6.0  ;;  %v703_v5 = vmax.f32 %v613_v59, 0.0  ;;  %v669_v8 = vmax.f32 %v477_v0, 0.0  ;;  %v701_v9 = vmax.f32 %v605_v1, 0.0  ;;  %v1360_v18 = vpop.f32.mrb[24].mxu0  ;;  %v1392_v19 = vpop.f32.mrb[24].mxu1 }
 0x10e   :  { %v732_v6 = vmin.f32 %v668_v62, 6.0  ;;  %v764_v7 = vmin.f32 %v700_v63, 6.0  ;;  %v1254_v10 = vpack.c.bf16 %v734_v2, %v734_v2  ;;  %v735_v12 = vmin.f32 %v671_v4, 6.0  ;;  %v489_v24 = vpop.f32.mrb[25].mxu0  ;;  %v617_v25 = vpop.f32.mrb[25].mxu1 }
 0x10f   :  { %v1286_v11 = vpack.c.bf16 %v766_v3, %v766_v3  ;;  %v767_v13 = vmin.f32 %v703_v5, 6.0  ;;  %v733_v16 = vmin.f32 %v669_v8, 6.0  ;;  %v765_v17 = vmin.f32 %v701_v9, 6.0  ;;  %v1361_v30 = vpop.f32.mrb[26].mxu0  ;;  %v1393_v31 = vpop.f32.mrb[26].mxu1 }
 0x110   :  { %v1252_v14 = vpack.c.bf16 %v732_v6, %v732_v6  ;;  %v1284_v15 = vpack.c.bf16 %v764_v7, %v764_v7  ;;  %1055 = vst.msk [vmem:[%s1918_s3 + $0x58] sm:$0xf] %vm1032_vm1, %v1254_v10  ;;  %v1255_v20 = vpack.c.bf16 %v735_v12, %v735_v12  ;;  %v498_v22 = vadd.f32 %v1360_v18, %v1593_v34  ;;  %v492_v37 = vpop.f32.mrb[27].mxu0  ;;  %v620_v38 = vpop.f32.mrb[27].mxu1 }
 0x111   :  { %1087 = vst.msk [vmem:[%s1918_s3 + $0xd8] sm:$0xf] %vm1032_vm1, %v1286_v11  ;;  %v1287_v21 = vpack.c.bf16 %v767_v13, %v767_v13  ;;  %v626_v23 = vadd.f32 %v1392_v19, %v1593_v34  ;;  %v1253_v26 = vpack.c.bf16 %v733_v16, %v733_v16  ;;  %v1285_v27 = vpack.c.bf16 %v765_v17, %v765_v17 }
 0x112   :  { %1053 = vst.msk [vmem:[%s1918_s3 + $0x50] sm:$0xf] %vm1032_vm1, %v1252_v14  ;;  %1085 = vst.msk [vmem:[%s1918_s3 + $0xd0] sm:$0xf] %vm1032_vm1, %v1284_v15  ;;  %v490_v28 = vadd.f32 %v1593_v34, %v489_v24  ;;  %v618_v29 = vadd.f32 %v1593_v34, %v617_v25  ;;  %v674_v32 = vmax.f32 %v498_v22, 0.0  ;;  %v501_v35 = vadd.f32 %v1361_v30, %v1593_v34 }
 0x113   :  { %1056 = vst.msk [vmem:[%s1918_s3 + $0x5c] sm:$0xf] %vm1032_vm1, %v1255_v20  ;;  %1088 = vst.msk [vmem:[%s1918_s3 + $0xdc] sm:$0xf] %vm1032_vm1, %v1287_v21  ;;  %v706_v33 = vmax.f32 %v626_v23, 0.0  ;;  %v629_v36 = vadd.f32 %v1393_v31, %v1593_v34  ;;  %v493_v41 = vadd.f32 %v1593_v34, %v492_v37  ;;  %v621_v42 = vadd.f32 %v1593_v34, %v620_v38 }
 0x114   :  { %1054 = vst.msk [vmem:[%s1918_s3 + $0x54] sm:$0xf] %vm1032_vm1, %v1253_v26  ;;  %1086 = vst.msk [vmem:[%s1918_s3 + $0xd4] sm:$0xf] %vm1032_vm1, %v1285_v27  ;;  %v672_v39 = vmax.f32 %v490_v28, 0.0  ;;  %v704_v40 = vmax.f32 %v618_v29, 0.0 }
 0x115   :  { %v738_v43 = vmin.f32 %v674_v32, 6.0  ;;  %v770_v44 = vmin.f32 %v706_v33, 6.0  ;;  %v675_v45 = vmax.f32 %v501_v35, 0.0  ;;  %v707_v46 = vmax.f32 %v629_v36, 0.0  ;;  %v1364_v59 = vpop.f32.mrb[28].mxu0  ;;  %v1396_v60 = vpop.f32.mrb[28].mxu1 }
 0x116   :  { %v736_v47 = vmin.f32 %v672_v39, 6.0  ;;  %v768_v48 = vmin.f32 %v704_v40, 6.0  ;;  %v673_v49 = vmax.f32 %v493_v41, 0.0  ;;  %v705_v50 = vmax.f32 %v621_v42, 0.0  ;;  %v505_v1 = vpop.f32.mrb[29].mxu0  ;;  %v633_v2 = vpop.f32.mrb[29].mxu1 }
 0x117   :  { %v1258_v51 = vpack.c.bf16 %v738_v43, %v738_v43  ;;  %v1290_v52 = vpack.c.bf16 %v770_v44, %v770_v44  ;;  %v739_v53 = vmin.f32 %v675_v45, 6.0  ;;  %v771_v54 = vmin.f32 %v707_v46, 6.0  ;;  %v1365_v7 = vpop.f32.mrb[30].mxu0  ;;  %v1397_v8 = vpop.f32.mrb[30].mxu1 }
 0x118   :  { %v1256_v55 = vpack.c.bf16 %v736_v47, %v736_v47  ;;  %v1288_v56 = vpack.c.bf16 %v768_v48, %v768_v48  ;;  %v737_v57 = vmin.f32 %v673_v49, 6.0  ;;  %v769_v58 = vmin.f32 %v705_v50, 6.0  ;;  %v508_v13 = vpop.f32.mrb[31].mxu0  ;;  %v636_v14 = vpop.f32.mrb[31].mxu1 }
 0x119   :  { %1059 = vst.msk [vmem:[%s1918_s3 + $0x68] sm:$0xf] %vm1032_vm1, %v1258_v51  ;;  %1091 = vst.msk [vmem:[%s1918_s3 + $0xe8] sm:$0xf] %vm1032_vm1, %v1290_v52  ;;  %v1259_v61 = vpack.c.bf16 %v739_v53, %v739_v53  ;;  %v1291_v62 = vpack.c.bf16 %v771_v54, %v771_v54  ;;  %v514_v63 = vadd.f32 %v1364_v59, %v1593_v34 }
 0x11a   :  { %v642_v0 = vadd.f32 %v1396_v60, %v1593_v34  ;;  %1057 = vst.msk [vmem:[%s1918_s3 + $0x60] sm:$0xf] %vm1032_vm1, %v1256_v55  ;;  %1089 = vst.msk [vmem:[%s1918_s3 + $0xe0] sm:$0xf] %vm1032_vm1, %v1288_v56  ;;  %v1257_v3 = vpack.c.bf16 %v737_v57, %v737_v57  ;;  %v1289_v4 = vpack.c.bf16 %v769_v58, %v769_v58 }
 0x11b   :  { %v506_v5 = vadd.f32 %v1593_v34, %v505_v1  ;;  %v634_v6 = vadd.f32 %v1593_v34, %v633_v2  ;;  %1060 = vst.msk [vmem:[%s1918_s3 + $0x6c] sm:$0xf] %vm1032_vm1, %v1259_v61  ;;  %1092 = vst.msk [vmem:[%s1918_s3 + $0xec] sm:$0xf] %vm1032_vm1, %v1291_v62  ;;  %v678_v9 = vmax.f32 %v514_v63, 0.0  ;;  %v517_v11 = vadd.f32 %v1365_v7, %v1593_v34 }
 0x11c   :  { %v710_v10 = vmax.f32 %v642_v0, 0.0  ;;  %v645_v12 = vadd.f32 %v1397_v8, %v1593_v34  ;;  %1058 = vst.msk [vmem:[%s1918_s3 + $0x64] sm:$0xf] %vm1032_vm1, %v1257_v3  ;;  %1090 = vst.msk [vmem:[%s1918_s3 + $0xe4] sm:$0xf] %vm1032_vm1, %v1289_v4  ;;  %v509_v17 = vadd.f32 %v1593_v34, %v508_v13  ;;  %v637_v18 = vadd.f32 %v1593_v34, %v636_v14 }
 0x11d   :  { %v676_v15 = vmax.f32 %v506_v5, 0.0  ;;  %v708_v16 = vmax.f32 %v634_v6, 0.0  ;;  %v742_v19 = vmin.f32 %v678_v9, 6.0  ;;  %v679_v21 = vmax.f32 %v517_v11, 0.0 }
 0x11e   :  { %v774_v20 = vmin.f32 %v710_v10, 6.0  ;;  %v711_v22 = vmax.f32 %v645_v12, 0.0  ;;  %v677_v25 = vmax.f32 %v509_v17, 0.0  ;;  %v709_v26 = vmax.f32 %v637_v18, 0.0 }
 0x11f   :  { %v740_v23 = vmin.f32 %v676_v15, 6.0  ;;  %v772_v24 = vmin.f32 %v708_v16, 6.0  ;;  %v1262_v27 = vpack.c.bf16 %v742_v19, %v742_v19  ;;  %v743_v29 = vmin.f32 %v679_v21, 6.0 }
 0x120   :  { %v1294_v28 = vpack.c.bf16 %v774_v20, %v774_v20  ;;  %v775_v30 = vmin.f32 %v711_v22, 6.0  ;;  %v741_v33 = vmin.f32 %v677_v25, 6.0  ;;  %v773_v35 = vmin.f32 %v709_v26, 6.0 }
 0x121   :  { %v1260_v31 = vpack.c.bf16 %v740_v23, %v740_v23  ;;  %v1292_v32 = vpack.c.bf16 %v772_v24, %v772_v24  ;;  %1063 = vst.msk [vmem:[%s1918_s3 + $0x78] sm:$0xf] %vm1032_vm1, %v1262_v27  ;;  %v1263_v34 = vpack.c.bf16 %v743_v29, %v743_v29 }
 0x122   :  { %1095 = vst.msk [vmem:[%s1918_s3 + $0xf8] sm:$0xf] %vm1032_vm1, %v1294_v28  ;;  %v1295_v36 = vpack.c.bf16 %v775_v30, %v775_v30  ;;  %v1261_v37 = vpack.c.bf16 %v741_v33, %v741_v33  ;;  %v1293_v38 = vpack.c.bf16 %v773_v35, %v773_v35 }
 0x123   :  { %1061 = vst.msk [vmem:[%s1918_s3 + $0x70] sm:$0xf] %vm1032_vm1, %v1260_v31  ;;  %1093 = vst.msk [vmem:[%s1918_s3 + $0xf0] sm:$0xf] %vm1032_vm1, %v1292_v32 }
 0x124   :  { %1064 = vst.msk [vmem:[%s1918_s3 + $0x7c] sm:$0xf] %vm1032_vm1, %v1263_v34  ;;  %1096 = vst.msk [vmem:[%s1918_s3 + $0xfc] sm:$0xf] %vm1032_vm1, %v1295_v36 }
 0x125   :  { %1062 = vst.msk [vmem:[%s1918_s3 + $0x74] sm:$0xf] %vm1032_vm1, %v1261_v37  ;;  %1094 = vst.msk [vmem:[%s1918_s3 + $0xf4] sm:$0xf] %vm1032_vm1, %v1293_v38 }

</bundles_post_ra>
